<compile_context>
chip_gen: v5e
topology: v5e:2x2
jax: 0.10.0
libtpu: 0.0.40
codegen_flags: <defaults>
</compile_context>

<pallas_src>
import jax
import jax.numpy as jnp
from jax.experimental import pallas as pl
from jax.experimental.pallas import tpu as pltpu


# ---------------------------------------------------------------------------
# Kernel
# ---------------------------------------------------------------------------
def _make_mlp_kernel(act_dtype):
    """Fused 4-layer MLP.  `act_dtype` is the elementwise (bias-add/ReLU)
    dtype: bf16 on chips with a bf16 VALU (v6e/v7x), f32 on v5e."""

    def kernel(x_ref, w1_ref, b1_ref, w2_ref, b2_ref,
               w3_ref, b3_ref, w4_ref, b4_ref, o_ref):
        # NOTE: rows of the x tile beyond the real batch (last partial tile)
        # hold undefined data.  Every row is independent and padded rows are
        # masked on writeback, so valid outputs are unaffected.  Do NOT add a
        # cross-row reduction here without masking those rows first.

        # Layer 1: Linear(in, 128) + ReLU.  bf16 MXU inputs, f32 accumulation.
        # TODO(synk): training-mode dropout (pltpu.prng_seed +
        # pltpu.stateful_bernoulli) not implemented; eval mode => identity.
        h = jnp.dot(x_ref[...], w1_ref[...], preferred_element_type=jnp.float32)
        h = jnp.maximum(h.astype(act_dtype) + b1_ref[...], 0).astype(jnp.bfloat16)

        # Layer 2: Linear(128, 64) + ReLU
        h = jnp.dot(h, w2_ref[...], preferred_element_type=jnp.float32)
        h = jnp.maximum(h.astype(act_dtype) + b2_ref[...], 0).astype(jnp.bfloat16)

        # Layer 3: Linear(64, 32) + ReLU
        h = jnp.dot(h, w3_ref[...], preferred_element_type=jnp.float32)
        h = jnp.maximum(h.astype(act_dtype) + b3_ref[...], 0).astype(jnp.bfloat16)

        # Layer 4: Linear(32, 2) logits; bias-add kept in f32.
        out = jnp.dot(h, w4_ref[...], preferred_element_type=jnp.float32)
        out = out + b4_ref[...]

        # Lane-dense store: (block_m, 2) -> (2, block_m).  Store is unmasked
        # and the HBM writeback is contiguous along block_m.
        o_ref[...] = out.T.astype(o_ref.dtype)

    return kernel


# ---------------------------------------------------------------------------
# Tiling / hardware heuristics
# ---------------------------------------------------------------------------
def _round_up(v, m):
    return ((v + m - 1) // m) * m


def _device_kind():
    try:
        return jax.devices()[0].device_kind.lower()
    except Exception:
        return ""


def _has_bf16_valu():
    # v6e / v7x have a bf16 VALU; v5e (and older) do not -> keep f32 there.
    k = _device_kind()
    return ("v6" in k) or ("v7" in k) or ("7x" in k)


def _num_tensorcores():
    # Prefer an explicit query; fall back to the device-kind string
    # (v7x has 2 TensorCores per chip, v5e/v6e have 1).
    try:
        info = pltpu.get_tpu_info()
        for attr in ("num_cores", "core_count", "num_tensorcores",
                     "tensorcore_count"):
            v = getattr(info, attr, None)
            if isinstance(v, int) and v > 0:
                return v
    except Exception:
        pass
    k = _device_kind()
    if "v7" in k or "7x" in k:
        return 2
    return 1


def _pick_block_m(batch, num_cores):
    """Row-tile size.

    The (8,128) rule plus the lane-dense (n_out, block_m) output block require
    block_m to be either a multiple of 128 or exactly == batch.
    """
    if num_cores <= 1:
        # Single TC: the grid is a serial loop (extra steps ~0.35 us each);
        # prefer one big tile, 2048-row tiles only for huge batches.
        return batch if batch <= 2048 else 2048
    # Multi-TC (v7x): guarantee >= num_cores grid steps once there is enough
    # work to split, so both cores get work on the "parallel" batch axis.
    if batch < 128 * num_cores:
        return batch
    per_core = pl.cdiv(batch, num_cores)
    return max(128, min(1024, _round_up(per_core, 128)))


def _footprint_bytes(block_m, in_features, hidden, n_out, act_bytes):
    h1, h2, h3 = hidden
    weights = 2 * (in_features * h1 + h1 * h2 + h2 * h3 + h3 * n_out)  # bf16
    biases = act_bytes * (h1 + h2 + h3) + 4 * n_out
    x_tile = 2 * block_m * in_features            # bf16
    o_tile = 4 * n_out * block_m                  # f32
    inter = 4 * block_m * (h1 + h2 + h3)          # f32 upper bound
    # x/out tiles and parameters are double-buffered by the default pipeline.
    return 2 * (x_tile + o_tile + weights + biases) + inter


# ---------------------------------------------------------------------------
# Wrapper
# ---------------------------------------------------------------------------
def simple_mlp_forward(x, params, *, block_m=None):
    """Inference forward of SimpleMLP.

    x: [B, input_size] float32.
    params: list of (W_t, b) with W_t pre-transposed to (in, out) and
            b of shape (1, out).
    Returns [B, 2] float32 logits.
    """
    B, in_features = x.shape
    (w1, b1), (w2, b2), (w3, b3), (w4, b4) = params
    h1, h2, h3 = w1.shape[1], w2.shape[1], w3.shape[1]
    n_out = w4.shape[1]

    num_cores = _num_tensorcores()
    act_dtype = jnp.bfloat16 if _has_bf16_valu() else jnp.float32
    act_bytes = 2 if act_dtype == jnp.bfloat16 else 4

    if block_m is None:
        block_m = _pick_block_m(B, num_cores)
        # Shrink (keeping the multiple-of-128 invariant) if a very wide input
        # would blow the VMEM budget.
        while (block_m > 256 and
               _footprint_bytes(block_m, in_features, (h1, h2, h3), n_out,
                                act_bytes) > 24 * 1024 * 1024):
            block_m = max(256, _round_up(block_m // 2, 128))

    # bf16 operands for the MXU; hidden-layer biases in the elementwise dtype,
    # final bias in f32 (logit precision).
    x_bf16 = x.astype(jnp.bfloat16)
    w1b, w2b, w3b, w4b = (w.astype(jnp.bfloat16) for w in (w1, w2, w3, w4))
    b1a, b2a, b3a = (b.astype(act_dtype) for b in (b1, b2, b3))
    b4f = b4.astype(jnp.float32)

    # Constant index_map => parameters are DMA'd once and stay VMEM-resident
    # across all grid steps.  (pl.Buffered(1) single-buffering would shave the
    # redundant second buffer; at ~100 KB of weights here it is noise, so we
    # keep the default to avoid extra pipeline bookkeeping.)
    def full_spec(arr):
        return pl.BlockSpec(arr.shape, lambda i: (0,) * arr.ndim)

    grid = (pl.cdiv(B, block_m),)

    flops = 2 * B * (in_features * h1 + h1 * h2 + h2 * h3 + h3 * n_out)
    bytes_accessed = (
        x_bf16.size * 2
        + sum(w.size * 2 for w in (w1b, w2b, w3b, w4b))
        + sum(b.size * act_bytes for b in (b1a, b2a, b3a)) + b4f.size * 4
        + B * n_out * 4)

    vmem_limit = int(min(32 * 1024 * 1024,
                         max(16 * 1024 * 1024,
                             2 * _footprint_bytes(block_m, in_features,
                                                  (h1, h2, h3), n_out,
                                                  act_bytes))))

    out_t = pl.pallas_call(
        _make_mlp_kernel(act_dtype),
        out_shape=jax.ShapeDtypeStruct((n_out, B), jnp.float32),
        grid_spec=pltpu.PrefetchScalarGridSpec(
            num_scalar_prefetch=0,
            grid=grid,
            in_specs=[
                pl.BlockSpec((block_m, in_features), lambda i: (i, 0)),  # x
                full_spec(w1b), full_spec(b1a),
                full_spec(w2b), full_spec(b2a),
                full_spec(w3b), full_spec(b3a),
                full_spec(w4b), full_spec(b4f),
            ],
            out_specs=pl.BlockSpec((n_out, block_m), lambda i: (0, i)),
        ),
        compiler_params=pltpu.CompilerParams(
            dimension_semantics=("parallel",),
            vmem_limit_bytes=vmem_limit,
        ),
        cost_estimate=pl.CostEstimate(
            flops=flops, transcendentals=0, bytes_accessed=bytes_accessed),
    )(x_bf16, w1b, b1a, w2b, b2a, w3b, b3a, w4b, b4f)

    # Back to the PyTorch layout: (B, n_out).
    return out_t.T


# ---------------------------------------------------------------------------
# Params + reference
# ---------------------------------------------------------------------------
def init_params(key, input_size, hidden_sizes=(128, 64, 32), n_classes=2):
    """torch.nn.Linear-style init (uniform +/- 1/sqrt(fan_in)); weights stored
    already transposed to (in_features, out_features)."""
    sizes = [input_size, *hidden_sizes, n_classes]
    params = []
    for fan_in, fan_out in zip(sizes[:-1], sizes[1:]):
        key, kw, kb = jax.random.split(key, 3)
        bound = 1.0 / (fan_in ** 0.5)
        w_t = jax.random.uniform(kw, (fan_in, fan_out), jnp.float32, -bound, bound)
        b = jax.random.uniform(kb, (1, fan_out), jnp.float32, -bound, bound)
        params.append((w_t, b))
    return params


def reference_forward(x, params, act_dtype=jnp.float32):
    """Pure-JAX reference with the same bf16-MXU / f32-accumulate numerics."""
    h = x.astype(jnp.bfloat16)
    n = len(params)
    for i, (w_t, b) in enumerate(params):
        acc = jnp.dot(h, w_t.astype(jnp.bfloat16),
                      preferred_element_type=jnp.float32)
        if i < n - 1:
            acc = jnp.maximum(acc.astype(act_dtype) + b.astype(act_dtype), 0)
            h = acc.astype(jnp.bfloat16)
        else:
            h = acc + b.astype(jnp.float32)
    return h


if __name__ == "__main__":
    key = jax.random.PRNGKey(0)
    k_x, k_p = jax.random.split(key)

    batch = 8
    input_size = 32
    x = jax.random.normal(k_x, (batch, input_size), jnp.float32)
    params = init_params(k_p, input_size)

    y = simple_mlp_forward(x, params)
    y = jax.block_until_ready(y)

    act_dtype = jnp.bfloat16 if _has_bf16_valu() else jnp.float32
    y_ref = reference_forward(x, params, act_dtype)

    assert y.shape == (batch, 2)
    # bf16 MXU inputs / bf16 or f32 elementwise -> loose tolerance vs the
    # numerics-matched JAX reference (and vs a pure-f32 PyTorch forward).
    assert jnp.allclose(y, y_ref, atol=2e-2, rtol=2e-2), "mismatch vs JAX reference"

    print("KERNEL_OK")
</pallas_src>

<mosaic_0001>
module attributes {stable_mosaic.version = 11 : i64} {
  func.func @kernel(%arg0: i32, %arg1: memref<8x32xbf16, #tpu.memory_space<vmem>>, %arg2: memref<32x128xbf16, #tpu.memory_space<vmem>>, %arg3: memref<1x128xf32, #tpu.memory_space<vmem>>, %arg4: memref<128x64xbf16, #tpu.memory_space<vmem>>, %arg5: memref<1x64xf32, #tpu.memory_space<vmem>>, %arg6: memref<64x32xbf16, #tpu.memory_space<vmem>>, %arg7: memref<1x32xf32, #tpu.memory_space<vmem>>, %arg8: memref<32x2xbf16, #tpu.memory_space<vmem>>, %arg9: memref<1x2xf32, #tpu.memory_space<vmem>>, %arg10: memref<2x8xf32, #tpu.memory_space<vmem>>) attributes {dimension_semantics = [#tpu.dimension_semantics<parallel>], iteration_bounds = array<i64: 1>, scalar_prefetch = 0 : i64, scratch_operands = 0 : i64, tpu.core_type = #tpu.core_type<tc>, window_params = [{transform_indices = @transform_0, window_bounds = array<i64: 8, 32>}, {pipeline_mode = #tpu.pipeline_mode<synchronous>, transform_indices = @transform_1, window_bounds = array<i64: 32, 128>}, {pipeline_mode = #tpu.pipeline_mode<synchronous>, transform_indices = @transform_2, window_bounds = array<i64: 1, 128>}, {pipeline_mode = #tpu.pipeline_mode<synchronous>, transform_indices = @transform_3, window_bounds = array<i64: 128, 64>}, {pipeline_mode = #tpu.pipeline_mode<synchronous>, transform_indices = @transform_4, window_bounds = array<i64: 1, 64>}, {pipeline_mode = #tpu.pipeline_mode<synchronous>, transform_indices = @transform_5, window_bounds = array<i64: 64, 32>}, {pipeline_mode = #tpu.pipeline_mode<synchronous>, transform_indices = @transform_6, window_bounds = array<i64: 1, 32>}, {pipeline_mode = #tpu.pipeline_mode<synchronous>, transform_indices = @transform_7, window_bounds = array<i64: 32, 2>}, {pipeline_mode = #tpu.pipeline_mode<synchronous>, transform_indices = @transform_8, window_bounds = array<i64: 1, 2>}, {transform_indices = @transform_9, window_bounds = array<i64: 2, 8>}]} {
    %c0 = arith.constant 0 : index
    %c0_0 = arith.constant 0 : index
    %0 = vector.load %arg1[%c0, %c0_0] : memref<8x32xbf16, #tpu.memory_space<vmem>>, vector<8x32xbf16>
    %c0_1 = arith.constant 0 : index
    %c0_2 = arith.constant 0 : index
    %1 = vector.load %arg2[%c0_1, %c0_2] : memref<32x128xbf16, #tpu.memory_space<vmem>>, vector<32x128xbf16>
    %cst = arith.constant dense<0.000000e+00> : vector<8x128xf32>
    %2 = tpu.matmul %0, %1, %cst {dimension_numbers = #tpu.dot_dimension_numbers<[1], [0], [0], [1], [0, 0, 1, 1], [], []>} : vector<8x32xbf16>, vector<32x128xbf16>, vector<8x128xf32> -> vector<8x128xf32>
    %c0_3 = arith.constant 0 : index
    %c0_4 = arith.constant 0 : index
    %3 = vector.load %arg3[%c0_3, %c0_4] : memref<1x128xf32, #tpu.memory_space<vmem>>, vector<1x128xf32>
    %4 = vector.broadcast %3 : vector<1x128xf32> to vector<8x128xf32>
    %5 = arith.addf %2, %4 : vector<8x128xf32>
    %cst_5 = arith.constant 0.000000e+00 : f32
    %6 = vector.broadcast %cst_5 : f32 to vector<8x128xf32>
    %7 = arith.maximumf %5, %6 : vector<8x128xf32>
    %8 = arith.truncf %7 : vector<8x128xf32> to vector<8x128xbf16>
    %c0_6 = arith.constant 0 : index
    %c0_7 = arith.constant 0 : index
    %9 = vector.load %arg4[%c0_6, %c0_7] : memref<128x64xbf16, #tpu.memory_space<vmem>>, vector<128x64xbf16>
    %cst_8 = arith.constant dense<0.000000e+00> : vector<8x64xf32>
    %10 = tpu.matmul %8, %9, %cst_8 {dimension_numbers = #tpu.dot_dimension_numbers<[1], [0], [0], [1], [0, 0, 1, 1], [], []>} : vector<8x128xbf16>, vector<128x64xbf16>, vector<8x64xf32> -> vector<8x64xf32>
    %c0_9 = arith.constant 0 : index
    %c0_10 = arith.constant 0 : index
    %11 = vector.load %arg5[%c0_9, %c0_10] : memref<1x64xf32, #tpu.memory_space<vmem>>, vector<1x64xf32>
    %12 = vector.broadcast %11 : vector<1x64xf32> to vector<8x64xf32>
    %13 = arith.addf %10, %12 : vector<8x64xf32>
    %cst_11 = arith.constant 0.000000e+00 : f32
    %14 = vector.broadcast %cst_11 : f32 to vector<8x64xf32>
    %15 = arith.maximumf %13, %14 : vector<8x64xf32>
    %16 = arith.truncf %15 : vector<8x64xf32> to vector<8x64xbf16>
    %c0_12 = arith.constant 0 : index
    %c0_13 = arith.constant 0 : index
    %17 = vector.load %arg6[%c0_12, %c0_13] : memref<64x32xbf16, #tpu.memory_space<vmem>>, vector<64x32xbf16>
    %cst_14 = arith.constant dense<0.000000e+00> : vector<8x32xf32>
    %18 = tpu.matmul %16, %17, %cst_14 {dimension_numbers = #tpu.dot_dimension_numbers<[1], [0], [0], [1], [0, 0, 1, 1], [], []>} : vector<8x64xbf16>, vector<64x32xbf16>, vector<8x32xf32> -> vector<8x32xf32>
    %c0_15 = arith.constant 0 : index
    %c0_16 = arith.constant 0 : index
    %19 = vector.load %arg7[%c0_15, %c0_16] : memref<1x32xf32, #tpu.memory_space<vmem>>, vector<1x32xf32>
    %20 = vector.broadcast %19 : vector<1x32xf32> to vector<8x32xf32>
    %21 = arith.addf %18, %20 : vector<8x32xf32>
    %cst_17 = arith.constant 0.000000e+00 : f32
    %22 = vector.broadcast %cst_17 : f32 to vector<8x32xf32>
    %23 = arith.maximumf %21, %22 : vector<8x32xf32>
    %24 = arith.truncf %23 : vector<8x32xf32> to vector<8x32xbf16>
    %c0_18 = arith.constant 0 : index
    %c0_19 = arith.constant 0 : index
    %25 = vector.load %arg8[%c0_18, %c0_19] : memref<32x2xbf16, #tpu.memory_space<vmem>>, vector<32x2xbf16>
    %cst_20 = arith.constant dense<0.000000e+00> : vector<8x2xf32>
    %26 = tpu.matmul %24, %25, %cst_20 {dimension_numbers = #tpu.dot_dimension_numbers<[1], [0], [0], [1], [0, 0, 1, 1], [], []>} : vector<8x32xbf16>, vector<32x2xbf16>, vector<8x2xf32> -> vector<8x2xf32>
    %c0_21 = arith.constant 0 : index
    %c0_22 = arith.constant 0 : index
    %27 = vector.load %arg9[%c0_21, %c0_22] : memref<1x2xf32, #tpu.memory_space<vmem>>, vector<1x2xf32>
    %28 = vector.broadcast %27 : vector<1x2xf32> to vector<8x2xf32>
    %29 = arith.addf %26, %28 : vector<8x2xf32>
    %30 = tpu.transpose %29, [1, 0] : vector<8x2xf32> -> vector<2x8xf32>
    %c0_23 = arith.constant 0 : index
    %c0_24 = arith.constant 0 : index
    %31 = vector.load %arg10[%c0_23, %c0_24] : memref<2x8xf32, #tpu.memory_space<vmem>>, vector<2x8xf32>
    tpu.vector_store %arg10[%c0_23, %c0_24], %30 {strides = array<i32>} : memref<2x8xf32, #tpu.memory_space<vmem>>, vector<2x8xf32>,
    return
  }
  func.func @transform_0(%arg0: i32) -> (i32, i32) {
    %c0_i32 = arith.constant 0 : i32
    %c0_i32_0 = arith.constant 0 : i32
    return %arg0, %c0_i32 : i32, i32
  }
  func.func @transform_1(%arg0: i32) -> (i32, i32) {
    %c0_i32 = arith.constant 0 : i32
    %c0_i32_0 = arith.constant 0 : i32
    %c0_i32_1 = arith.constant 0 : i32
    return %c0_i32, %c0_i32_0 : i32, i32
  }
  func.func @transform_2(%arg0: i32) -> (i32, i32) {
    %c0_i32 = arith.constant 0 : i32
    %c0_i32_0 = arith.constant 0 : i32
    %c0_i32_1 = arith.constant 0 : i32
    return %c0_i32, %c0_i32_0 : i32, i32
  }
  func.func @transform_3(%arg0: i32) -> (i32, i32) {
    %c0_i32 = arith.constant 0 : i32
    %c0_i32_0 = arith.constant 0 : i32
    %c0_i32_1 = arith.constant 0 : i32
    return %c0_i32, %c0_i32_0 : i32, i32
  }
  func.func @transform_4(%arg0: i32) -> (i32, i32) {
    %c0_i32 = arith.constant 0 : i32
    %c0_i32_0 = arith.constant 0 : i32
    %c0_i32_1 = arith.constant 0 : i32
    return %c0_i32, %c0_i32_0 : i32, i32
  }
  func.func @transform_5(%arg0: i32) -> (i32, i32) {
    %c0_i32 = arith.constant 0 : i32
    %c0_i32_0 = arith.constant 0 : i32
    %c0_i32_1 = arith.constant 0 : i32
    return %c0_i32, %c0_i32_0 : i32, i32
  }
  func.func @transform_6(%arg0: i32) -> (i32, i32) {
    %c0_i32 = arith.constant 0 : i32
    %c0_i32_0 = arith.constant 0 : i32
    %c0_i32_1 = arith.constant 0 : i32
    return %c0_i32, %c0_i32_0 : i32, i32
  }
  func.func @transform_7(%arg0: i32) -> (i32, i32) {
    %c0_i32 = arith.constant 0 : i32
    %c0_i32_0 = arith.constant 0 : i32
    %c0_i32_1 = arith.constant 0 : i32
    return %c0_i32, %c0_i32_0 : i32, i32
  }
  func.func @transform_8(%arg0: i32) -> (i32, i32) {
    %c0_i32 = arith.constant 0 : i32
    %c0_i32_0 = arith.constant 0 : i32
    %c0_i32_1 = arith.constant 0 : i32
    return %c0_i32, %c0_i32_0 : i32, i32
  }
  func.func @transform_9(%arg0: i32) -> (i32, i32) {
    %c0_i32 = arith.constant 0 : i32
    %c0_i32_0 = arith.constant 0 : i32
    return %c0_i32, %arg0 : i32, i32
  }
}

</mosaic_0001>

<bundles_post_ra>
// kernel: tpu_custom_call.1
= control target key start
LH: loop header
LB: loop body
LE: loop exit
PB: predicated region body
PF: predicated region fallthrough
CT: control target
= control target key end

     0   :  { %s532_s0 = inlined_call_operand.vmem [shape: bf16[8,32], index: 0, kind: input, shape index: {}]   ;;  %s533_s1 = inlined_call_operand.vmem [shape: bf16[32,128], index: 1, kind: input, shape index: {}]   ;;  %s534_s2 = inlined_call_operand.vmem [shape: f32[1,128], index: 2, kind: input, shape index: {}]   ;;  %s535_s3 = inlined_call_operand.vmem [shape: bf16[128,64], index: 3, kind: input, shape index: {}]   ;;  %s536_s4 = inlined_call_operand.vmem [shape: f32[1,64], index: 4, kind: input, shape index: {}]   ;;  %s537_s5 = inlined_call_operand.vmem [shape: bf16[64,32], index: 5, kind: input, shape index: {}]   ;;  %s538_s6 = inlined_call_operand.vmem [shape: f32[1,32], index: 6, kind: input, shape index: {}]   ;;  %s539_s7 = inlined_call_operand.vmem [shape: bf16[32,2], index: 7, kind: input, shape index: {}]   ;;  %s540_s8 = inlined_call_operand.vmem [shape: f32[1,2], index: 8, kind: input, shape index: {}]   ;;  %s541_s9 = inlined_call_operand.hbm [shape: f32[2,8], index: 9, kind: output, shape index: {}]  }
   0x1   :  { %v366_v0 = vld [vmem:[%s533_s1 + $0x8] sm:$0xff]  ;;  %v374_v1 = vld [vmem:[%s535_s3 + $0x38] sm:$0xff]  ;;  %v365_v2 = vld [vmem:[%s533_s1] sm:$0xff] }
   0x2   :  { %65 = vmatpush.bf16.msra.mxu0 %v366_v0  ;;  %142 = vmatpush.bf16.msra.mxu1 %v374_v1  ;;  %v373_v3 = vld [vmem:[%s535_s3 + $0x30] sm:$0xff] }
   0x3   :  { %14 = vsyncpa [#allocation3], 0  ;;  %v34_v4 = vld [vmem:[%s532_s0] sm:$0xf]  ;;  %vm55_vm0 = vcmask 261120   ;;  %v372_v5 = vld [vmem:[%s535_s3 + $0x28] sm:$0xff] }
   0x4   :  { %v371_v6 = vld [vmem:[%s535_s3 + $0x20] sm:$0xff]  ;;  %v370_v7 = vld [vmem:[%s535_s3 + $0x18] sm:$0xff]  ;;  %v369_v8 = vld [vmem:[%s535_s3 + $0x10] sm:$0xff]  ;;  %vm193_vm1 = vcmask 523264   ;;  %vm280_vm2 = vcmask 58368  }
   0x5   :  { %v368_v9 = vld [vmem:[%s535_s3 + $0x8] sm:$0xff]  ;;  %v367_v10 = vld [vmem:[%s535_s3] sm:$0xff]  ;;  %v378_v11 = vld [vmem:[%s537_s5 + $0x18] sm:$0xff] }
   0x6   :  { %66 = vmatpush.bf16.msra.mxu0 %v365_v2  ;;  %143 = vmatpush.bf16.msra.mxu1 %v373_v3  ;;  %v377_v12 = vld [vmem:[%s537_s5 + $0x10] sm:$0xff]  ;;  %v383_v13 = vld [vmem:[%s534_s2] ss:$0 sm:$0xff]  ;;  %v376_v19 = vld [vmem:[%s537_s5 + $0x8] sm:$0xff] }
   0x7   :  { %201 = vmatpush.bf16.msra.mxu2 %v378_v11  ;;  %v375_v20 = vld [vmem:[%s537_s5] sm:$0xff]  ;;  %v380_v27 = vld [vmem:[%s539_s7 + $0x8] sm:$0xff] }
   0x8   :  { %v384_v21 = vld [vmem:[%s536_s4] ss:$0 sm:$0xff]  ;;  %241 = vmatpush.bf16.msra.mxu3 %v380_v27 }
   0x9   :  { %306 = vmatmul.msk.bf16.vlgmr.msra.gmra.mxu0 %vm55_vm0, %v34_v4  ;;  %v379_v28 = vld [vmem:[%s539_s7] sm:$0xff]  ;;  %s413_s7 = smov [#allocation2]  }
   0xa   :  { %144 = vmatpush.bf16.msra.mxu1 %v372_v5  ;;  %v385_v29 = vld [vmem:[%s538_s6] ss:$0 sm:$0xff]  ;;  %s287_s23 = sshll.u32 %s413_s7, 4  ;;  %s289_s6 = sshll.u32 %s541_s9, 4  ;;  %s288_s23 = int_to_ptr.vmem [resolvable:$true] %s287_s23  ;;  %s290_s6 = int_to_ptr.hbm [resolvable:$true] %s289_s6 }
   0xb   :  { %202 = vmatpush.bf16.msra.mxu2 %v377_v12  ;;  %v386_v35 = vld [vmem:[%s540_s8] ss:$0 sm:$0xff] }
   0xc   :  { %242 = vmatpush.bf16.msra.mxu3 %v379_v28 }
   0xe   :  { %145 = vmatpush.bf16.msra.mxu1 %v371_v6 }
   0xf   :  { %203 = vmatpush.bf16.msra.mxu2 %v376_v19 }
  0x12   :  { %146 = vmatpush.bf16.msra.mxu1 %v370_v7 }
  0x13   :  { %204 = vmatpush.bf16.msra.mxu2 %v375_v20 }
  0x16   :  { %147 = vmatpush.bf16.msra.mxu1 %v369_v8 }
  0x1a   :  { %148 = vmatpush.bf16.msra.mxu1 %v368_v9 }
  0x1e   :  { %149 = vmatpush.bf16.msra.mxu1 %v367_v10 }
  0x86   :  { %v68_v14 = vpop.f32.mrf.mxu0 }
  0x87   :  { %v69_v15 = vadd.f32 %v383_v13, %v68_v14 }
  0x89   :  { %v72_v16 = vmax.f32 %v69_v15, 0.0 }
  0x8b   :  { %v73_v17 = vpack.c.bf16 %v72_v16, %v72_v16 }
  0x8d   :  { %150 = vmatmul.bf16.vlgmr.msra.gmra.mxu1 %v73_v17 }
  0x8e   :  { %v70_v18 = vpop.f32.mrf.mxu0 }
 0x10a   :  { %v151_v22 = vpop.f32.mrf.mxu1 }
 0x10b   :  { %v152_v23 = vadd.f32 %v384_v21, %v151_v22 }
 0x10d   :  { %v155_v24 = vmax.f32 %v152_v23, 0.0 }
 0x10f   :  { %v156_v25 = vpack.c.bf16 %v155_v24, %v155_v24 }
 0x111   :  { %355 = vmatmul.msk.bf16.vlgmr.msra.gmra.mxu2 %vm193_vm1, %v156_v25 }
 0x112   :  { %v153_v26 = vpop.f32.mrf.mxu1 }
 0x194   :  { %v206_v30 = vpop.f32.mrf.mxu2 }
 0x195   :  { %v207_v31 = vadd.f32 %v385_v29, %v206_v30 }
 0x197   :  { %v210_v32 = vmax.f32 %v207_v31, 0.0 }
 0x199   :  { %v211_v33 = vpack.c.bf16 %v210_v32, %v210_v32 }
 0x19b   :  { %364 = vmatmul.msk.bf16.vlgmr.msra.gmra.mxu3 %vm55_vm0, %v211_v33 }
 0x19c   :  { %v208_v34 = vpop.f32.mrf.mxu2 }
 0x21e   :  { %v244_v36 = vpop.f32.mrf.mxu3 }
 0x21f   :  { %v245_v37 = vadd.f32 %v386_v35, %v244_v36 }
 0x221   :  { %248 = vxpose.xlu0.b32.start.end [1/1] (short) (narrow) %v245_v37, 8 }
 0x226   :  { %v246_v38 = vpop.f32.mrf.mxu3 }
 0x2c5   :  { %v264_v39 = vpop.trf.xlu0 }
 0x2c6   :  { %281 = vst.msk [vmem:[#allocation2] sm:$0x3] %vm280_vm2, %v264_v39 }
 0x2c7   :  { %292 = dma.vmem_to_hbm [thread:$0]  %s288_s23, 32, %s290_s6, [#allocation3]  }
 0x2c8   :  { %411 = dma.done.wait [#allocation3], 32  }
 0x2c9   :  { %412 = vsyncadd [#allocation3], 4294967264 }
 0x2ca   :  { %297 = vsyncpa [#allocation3], 1 }

</bundles_post_ra>
